<compile_context>
chip_gen: v7x
topology: tpu7x:2x2x1
jax: 0.10.0
libtpu: 0.0.40
codegen_flags: <defaults>
</compile_context>

<pallas_src>
import functools

import jax
import jax.numpy as jnp
from jax import lax
from jax.experimental import pallas as pl
from jax.experimental.pallas import tpu as pltpu


def _dema_kernel(x_ref, o_ref, s_ref, b_ref, *, alpha, beta, ch, unroll):
    # x_ref / o_ref: [tb, tt, tc] block (time on sublanes, channels on lanes).
    # s_ref / b_ref: [tb, tc] float32 carry, persistent across the T grid axis.
    k = pl.program_id(2)                       # innermost T-block index
    tb, tt, tc = x_ref.shape
    CH = min(ch, tt)                           # sublane-tile chunk of timesteps
    n_chunks = tt // CH                        # static
    rem = tt - n_chunks * CH                   # static (0 with default tiling)

    a = jnp.float32(alpha)                     # folded scalar constants
    ab = jnp.float32(alpha * beta)
    f32 = jnp.float32

    def steps(chunk, s, b, t_lo, rows):
        # chunk: (tb, n, tc) value already loaded; static row indices -> vreg
        # sublane extracts, no per-step VMEM traffic.
        n = chunk.shape[1]
        for t in range(t_lo, n):
            xt = chunk[:, t, :].astype(f32)
            p = s + b                          # level + trend prediction
            d = xt - p                         # innovation
            s = p + a * d                      # == alpha*xt + (1-alpha)*(s+b)
            b = b + ab * d                     # == beta*(s_new-s_old)+(1-beta)*b
            rows.append(s.astype(o_ref.dtype))
        return s, b, rows

    def run_chunks(c_lo, s0, b0):
        def body(ci, carry):
            s, b = carry
            c0 = pl.multiple_of(ci * CH, CH)   # aligned, unmasked chunk
            chunk = x_ref[:, pl.ds(c0, CH), :]             # one full-tile load
            s, b, rows = steps(chunk, s, b, 0, [])
            o_ref[:, pl.ds(c0, CH), :] = jnp.stack(rows, axis=1)  # one store
            return (s, b)

        s_fin, b_fin = lax.fori_loop(c_lo, n_chunks, body, (s0, b0),
                                     unroll=unroll)

        if rem:                                # only traced for odd user tiles
            tail = x_ref[:, tt - rem:tt, :]
            s_fin, b_fin, rows = steps(tail, s_fin, b_fin, 0, [])
            o_ref[:, tt - rem:tt, :] = jnp.stack(rows, axis=1)

        s_ref[...] = s_fin
        b_ref[...] = b_fin

    @pl.when(k == 0)
    def _first_block():
        # Prologue (t=0 copy, t=1 trend init) folded into the first chunk so
        # every VMEM access stays a full, aligned tile.
        chunk0 = x_ref[:, 0:CH, :]
        s0 = chunk0[:, 0, :].astype(f32)
        if CH > 1:                             # static; CH == 1 only when T == 1
            b0 = chunk0[:, 1, :].astype(f32) - s0
        else:
            b0 = jnp.zeros_like(s0)            # T == 1: trend never used
        rows = [s0.astype(o_ref.dtype)]
        s, b, rows = steps(chunk0, s0, b0, 1, rows)
        o_ref[:, 0:CH, :] = jnp.stack(rows, axis=1)
        run_chunks(1, s, b)

    @pl.when(k > 0)
    def _later_blocks():
        run_chunks(0, s_ref[...], b_ref[...])


def _choose_tiles(B, T, C, itemsize):
    # Lane (channel) tile: multiple of 128 (<= 512), or the full dim when it is
    # small / not 128-aligned; an oversize C is tiled at 512 with a masked tail.
    if C % 128 == 0:
        tc = min(C, 512)
    elif C < 512:
        tc = C
    else:
        tc = 512
    # Timestep chunk = sublane packing unit of the I/O dtype (8 f32, 16 bf16).
    ch = max(8, 32 // max(1, itemsize))
    # Time tile: multiple of ch, ~128 rows (bounds VMEM, keeps several T blocks
    # for pipelining); prefer a divisor of T to avoid a padded tail block.
    if T <= ch:
        tt = T
    else:
        cap = max(ch, (128 // ch) * ch)
        tt = min(cap, (T // ch) * ch)
        for m in range(tt, ch - 1, -ch):
            if T % m == 0:
                tt = m
                break
    # Batch planes: cap the per-chunk working set (input chunk + staged output
    # rows) so it fits the 64-entry vreg file: tb * ch * tc * itemsize <= 128 KiB.
    tb = max(1, min(B, 8, (128 * 1024) // max(1, tc * ch * itemsize)))
    return tb, tt, tc, ch


def _split_for_two_cores(B, C, tb, tc):
    # v7x has 2 TensorCores; keep >= 2 parallel (B, C) blocks when possible.
    if -(-B // tb) * -(-C // tc) >= 2:
        return tb, tc
    if tc % 256 == 0:
        return tb, tc // 2
    if tb >= 2:
        return tb // 2, tc
    return tb, tc


def dema(x, alpha, beta, *, tb=None, tt=None, tc=None, unroll=1):
    """x: [B, T, C]; alpha, beta: python scalars. Returns DEMA(x), same dtype."""
    B, T, C = x.shape
    alpha = float(alpha)
    beta = float(beta)
    itemsize = jnp.dtype(x.dtype).itemsize

    atb, att, atc, ch = _choose_tiles(B, T, C, itemsize)
    tb = atb if tb is None else tb
    tt = att if tt is None else tt
    tc = atc if tc is None else tc
    tb, tc = _split_for_two_cores(B, C, tb, tc)

    grid = (pl.cdiv(B, tb), pl.cdiv(C, tc), pl.cdiv(T, tt))
    kernel = functools.partial(_dema_kernel, alpha=alpha, beta=beta, ch=ch,
                               unroll=unroll)

    return pl.pallas_call(
        kernel,
        out_shape=jax.ShapeDtypeStruct((B, T, C), x.dtype),
        grid_spec=pltpu.PrefetchScalarGridSpec(
            num_scalar_prefetch=0,
            grid=grid,
            in_specs=[pl.BlockSpec((tb, tt, tc), lambda i, j, k: (i, k, j))],
            out_specs=pl.BlockSpec((tb, tt, tc), lambda i, j, k: (i, k, j)),
            scratch_shapes=[
                pltpu.VMEM((tb, tc), jnp.float32),   # carried level s_prev
                pltpu.VMEM((tb, tc), jnp.float32),   # carried trend b
            ],
        ),
        compiler_params=pltpu.CompilerParams(
            dimension_semantics=("parallel", "parallel", "arbitrary")),
    )(x)


def dema_ref(x, alpha, beta):
    """Pure-JAX reference mirroring the PyTorch loop (float32 recurrence)."""
    xf = x.astype(jnp.float32)
    s0 = xf[:, 0, :]
    b0 = xf[:, 1, :] - s0

    def step(carry, xt):
        s_prev, b = carry
        s = alpha * xt + (1 - alpha) * (s_prev + b)
        b = beta * (s - s_prev) + (1 - beta) * b
        return (s, b), s

    _, ys = lax.scan(step, (s0, b0), jnp.swapaxes(xf, 0, 1)[1:])
    out = jnp.concatenate([s0[:, None, :], jnp.swapaxes(ys, 0, 1)], axis=1)
    return out.astype(x.dtype)


if __name__ == "__main__":
    # Deterministic "parameters" (the module __init__ takes scalar alpha, beta).
    alpha = 0.3
    beta = 0.1

    key = jax.random.PRNGKey(0)
    k1, k2 = jax.random.split(key)

    # Small shape consistent with the module: batch=2, seq_len=8, channels=32.
    x = jax.random.normal(k1, (2, 8, 32), dtype=jnp.float32)
    out = jax.block_until_ready(dema(x, alpha, beta))
    ref = dema_ref(x, alpha, beta)
    assert out.shape == ref.shape, (out.shape, ref.shape)
    assert jnp.allclose(out, ref, atol=1e-5, rtol=1e-5), float(
        jnp.max(jnp.abs(out - ref)))

    # Larger check: exercises the multi-chunk time loop, multiple T blocks with
    # the carried (s, b) state, and >= 2 parallel (B, C) blocks.
    x2 = jax.random.normal(k2, (2, 256, 256), dtype=jnp.float32)
    out2 = jax.block_until_ready(dema(x2, alpha, beta))
    ref2 = dema_ref(x2, alpha, beta)
    assert jnp.allclose(out2, ref2, atol=1e-4, rtol=1e-4), float(
        jnp.max(jnp.abs(out2 - ref2)))

    print("KERNEL_OK")
</pallas_src>

<mosaic_0001>
module attributes {stable_mosaic.version = 11 : i64} {
  func.func @_dema_kernel(%arg0: i32, %arg1: i32, %arg2: i32, %arg3: memref<1x8x32xf32, #tpu.memory_space<vmem>>, %arg4: memref<1x8x32xf32, #tpu.memory_space<vmem>>, %arg5: memref<1x32xf32, #tpu.memory_space<vmem>>, %arg6: memref<1x32xf32, #tpu.memory_space<vmem>>) attributes {dimension_semantics = [#tpu.dimension_semantics<parallel>, #tpu.dimension_semantics<parallel>, #tpu.dimension_semantics<arbitrary>], iteration_bounds = array<i64: 2, 1, 1>, scalar_prefetch = 0 : i64, scratch_operands = 2 : i64, tpu.core_type = #tpu.core_type<tc>, window_params = [{transform_indices = @transform_0, window_bounds = array<i64: 1, 8, 32>}, {transform_indices = @transform_1, window_bounds = array<i64: 1, 8, 32>}]} {
    %c0_i32 = arith.constant 0 : i32
    %0 = arith.cmpi eq, %arg2, %c0_i32 : i32
    %1 = arith.extui %0 : i1 to i32
    %cst = arith.constant 3.000000e-01 : f32
    %cst_0 = arith.constant 3.000000e-02 : f32
    %c0_i32_1 = arith.constant 0 : i32
    %2 = arith.cmpi ne, %1, %c0_i32_1 : i32
    scf.if %2 {
      %c0 = arith.constant 0 : index
      %c0_6 = arith.constant 0 : index
      %c0_7 = arith.constant 0 : index
      %6 = vector.load %arg3[%c0, %c0_6, %c0_7] : memref<1x8x32xf32, #tpu.memory_space<vmem>>, vector<1x8x32xf32>
      %7 = vector.extract_strided_slice %6 {offsets = [0, 0, 0], sizes = [1, 1, 32], strides = [1, 1, 1]} : vector<1x8x32xf32> to vector<1x1x32xf32>
      %8 = vector.shape_cast %7 : vector<1x1x32xf32> to vector<1x32xf32>
      %9 = vector.extract_strided_slice %6 {offsets = [0, 1, 0], sizes = [1, 1, 32], strides = [1, 1, 1]} : vector<1x8x32xf32> to vector<1x1x32xf32>
      %10 = vector.shape_cast %9 : vector<1x1x32xf32> to vector<1x32xf32>
      %11 = arith.subf %10, %8 : vector<1x32xf32>
      %12 = vector.extract_strided_slice %6 {offsets = [0, 1, 0], sizes = [1, 1, 32], strides = [1, 1, 1]} : vector<1x8x32xf32> to vector<1x1x32xf32>
      %13 = vector.shape_cast %12 : vector<1x1x32xf32> to vector<1x32xf32>
      %14 = arith.addf %8, %11 : vector<1x32xf32>
      %15 = arith.subf %13, %14 : vector<1x32xf32>
      %16 = vector.broadcast %cst : f32 to vector<1x32xf32>
      %17 = arith.mulf %16, %15 : vector<1x32xf32>
      %18 = arith.addf %14, %17 : vector<1x32xf32>
      %19 = vector.broadcast %cst_0 : f32 to vector<1x32xf32>
      %20 = arith.mulf %19, %15 : vector<1x32xf32>
      %21 = arith.addf %11, %20 : vector<1x32xf32>
      %22 = vector.extract_strided_slice %6 {offsets = [0, 2, 0], sizes = [1, 1, 32], strides = [1, 1, 1]} : vector<1x8x32xf32> to vector<1x1x32xf32>
      %23 = vector.shape_cast %22 : vector<1x1x32xf32> to vector<1x32xf32>
      %24 = arith.addf %18, %21 : vector<1x32xf32>
      %25 = arith.subf %23, %24 : vector<1x32xf32>
      %26 = vector.broadcast %cst : f32 to vector<1x32xf32>
      %27 = arith.mulf %26, %25 : vector<1x32xf32>
      %28 = arith.addf %24, %27 : vector<1x32xf32>
      %29 = vector.broadcast %cst_0 : f32 to vector<1x32xf32>
      %30 = arith.mulf %29, %25 : vector<1x32xf32>
      %31 = arith.addf %21, %30 : vector<1x32xf32>
      %32 = vector.extract_strided_slice %6 {offsets = [0, 3, 0], sizes = [1, 1, 32], strides = [1, 1, 1]} : vector<1x8x32xf32> to vector<1x1x32xf32>
      %33 = vector.shape_cast %32 : vector<1x1x32xf32> to vector<1x32xf32>
      %34 = arith.addf %28, %31 : vector<1x32xf32>
      %35 = arith.subf %33, %34 : vector<1x32xf32>
      %36 = vector.broadcast %cst : f32 to vector<1x32xf32>
      %37 = arith.mulf %36, %35 : vector<1x32xf32>
      %38 = arith.addf %34, %37 : vector<1x32xf32>
      %39 = vector.broadcast %cst_0 : f32 to vector<1x32xf32>
      %40 = arith.mulf %39, %35 : vector<1x32xf32>
      %41 = arith.addf %31, %40 : vector<1x32xf32>
      %42 = vector.extract_strided_slice %6 {offsets = [0, 4, 0], sizes = [1, 1, 32], strides = [1, 1, 1]} : vector<1x8x32xf32> to vector<1x1x32xf32>
      %43 = vector.shape_cast %42 : vector<1x1x32xf32> to vector<1x32xf32>
      %44 = arith.addf %38, %41 : vector<1x32xf32>
      %45 = arith.subf %43, %44 : vector<1x32xf32>
      %46 = vector.broadcast %cst : f32 to vector<1x32xf32>
      %47 = arith.mulf %46, %45 : vector<1x32xf32>
      %48 = arith.addf %44, %47 : vector<1x32xf32>
      %49 = vector.broadcast %cst_0 : f32 to vector<1x32xf32>
      %50 = arith.mulf %49, %45 : vector<1x32xf32>
      %51 = arith.addf %41, %50 : vector<1x32xf32>
      %52 = vector.extract_strided_slice %6 {offsets = [0, 5, 0], sizes = [1, 1, 32], strides = [1, 1, 1]} : vector<1x8x32xf32> to vector<1x1x32xf32>
      %53 = vector.shape_cast %52 : vector<1x1x32xf32> to vector<1x32xf32>
      %54 = arith.addf %48, %51 : vector<1x32xf32>
      %55 = arith.subf %53, %54 : vector<1x32xf32>
      %56 = vector.broadcast %cst : f32 to vector<1x32xf32>
      %57 = arith.mulf %56, %55 : vector<1x32xf32>
      %58 = arith.addf %54, %57 : vector<1x32xf32>
      %59 = vector.broadcast %cst_0 : f32 to vector<1x32xf32>
      %60 = arith.mulf %59, %55 : vector<1x32xf32>
      %61 = arith.addf %51, %60 : vector<1x32xf32>
      %62 = vector.extract_strided_slice %6 {offsets = [0, 6, 0], sizes = [1, 1, 32], strides = [1, 1, 1]} : vector<1x8x32xf32> to vector<1x1x32xf32>
      %63 = vector.shape_cast %62 : vector<1x1x32xf32> to vector<1x32xf32>
      %64 = arith.addf %58, %61 : vector<1x32xf32>
      %65 = arith.subf %63, %64 : vector<1x32xf32>
      %66 = vector.broadcast %cst : f32 to vector<1x32xf32>
      %67 = arith.mulf %66, %65 : vector<1x32xf32>
      %68 = arith.addf %64, %67 : vector<1x32xf32>
      %69 = vector.broadcast %cst_0 : f32 to vector<1x32xf32>
      %70 = arith.mulf %69, %65 : vector<1x32xf32>
      %71 = arith.addf %61, %70 : vector<1x32xf32>
      %72 = vector.extract_strided_slice %6 {offsets = [0, 7, 0], sizes = [1, 1, 32], strides = [1, 1, 1]} : vector<1x8x32xf32> to vector<1x1x32xf32>
      %73 = vector.shape_cast %72 : vector<1x1x32xf32> to vector<1x32xf32>
      %74 = arith.addf %68, %71 : vector<1x32xf32>
      %75 = arith.subf %73, %74 : vector<1x32xf32>
      %76 = vector.broadcast %cst : f32 to vector<1x32xf32>
      %77 = arith.mulf %76, %75 : vector<1x32xf32>
      %78 = arith.addf %74, %77 : vector<1x32xf32>
      %79 = vector.broadcast %cst_0 : f32 to vector<1x32xf32>
      %80 = arith.mulf %79, %75 : vector<1x32xf32>
      %81 = arith.addf %71, %80 : vector<1x32xf32>
      %82 = vector.shape_cast %8 : vector<1x32xf32> to vector<1x1x32xf32>
      %83 = vector.shape_cast %18 : vector<1x32xf32> to vector<1x1x32xf32>
      %84 = vector.shape_cast %28 : vector<1x32xf32> to vector<1x1x32xf32>
      %85 = vector.shape_cast %38 : vector<1x32xf32> to vector<1x1x32xf32>
      %86 = vector.shape_cast %48 : vector<1x32xf32> to vector<1x1x32xf32>
      %87 = vector.shape_cast %58 : vector<1x32xf32> to vector<1x1x32xf32>
      %88 = vector.shape_cast %68 : vector<1x32xf32> to vector<1x1x32xf32>
      %89 = vector.shape_cast %78 : vector<1x32xf32> to vector<1x1x32xf32>
      %90 = tpu.concatenate %82, %83, %84, %85, %86, %87, %88, %89 in 1 : vector<1x1x32xf32>, vector<1x1x32xf32>, vector<1x1x32xf32>, vector<1x1x32xf32>, vector<1x1x32xf32>, vector<1x1x32xf32>, vector<1x1x32xf32>, vector<1x1x32xf32> -> vector<1x8x32xf32>
      %c0_8 = arith.constant 0 : index
      %c0_9 = arith.constant 0 : index
      %c0_10 = arith.constant 0 : index
      %91 = vector.load %arg4[%c0_8, %c0_9, %c0_10] : memref<1x8x32xf32, #tpu.memory_space<vmem>>, vector<1x8x32xf32>
      tpu.vector_store %arg4[%c0_8, %c0_9, %c0_10], %90 {strides = array<i32>} : memref<1x8x32xf32, #tpu.memory_space<vmem>>, vector<1x8x32xf32>,
      %c1_i32 = arith.constant 1 : i32
      %c0_i32_11 = arith.constant 0 : i32
      %92 = arith.addi %c1_i32, %c0_i32_11 : i32
      %c1_i32_12 = arith.constant 1 : i32
      %93:2 = scf.for %arg7 = %c1_i32 to %92 step %c1_i32_12 iter_args(%arg8 = %78, %arg9 = %81) -> (vector<1x32xf32>, vector<1x32xf32>)  : i32 {
        %c8_i32 = arith.constant 8 : i32
        %96 = arith.muli %arg7, %c8_i32 : i32
        %97 = tpu.assume_multiple %96, 8 : i32
        %c0_18 = arith.constant 0 : index
        %98 = arith.index_cast %97 : i32 to index
        %c0_19 = arith.constant 0 : index
        %99 = vector.load %arg3[%c0_18, %98, %c0_19] : memref<1x8x32xf32, #tpu.memory_space<vmem>>, vector<1x8x32xf32>
        %100 = vector.extract_strided_slice %99 {offsets = [0, 0, 0], sizes = [1, 1, 32], strides = [1, 1, 1]} : vector<1x8x32xf32> to vector<1x1x32xf32>
        %101 = vector.shape_cast %100 : vector<1x1x32xf32> to vector<1x32xf32>
        %102 = arith.addf %arg8, %arg9 : vector<1x32xf32>
        %103 = arith.subf %101, %102 : vector<1x32xf32>
        %104 = vector.broadcast %cst : f32 to vector<1x32xf32>
        %105 = arith.mulf %104, %103 : vector<1x32xf32>
        %106 = arith.addf %102, %105 : vector<1x32xf32>
        %107 = vector.broadcast %cst_0 : f32 to vector<1x32xf32>
        %108 = arith.mulf %107, %103 : vector<1x32xf32>
        %109 = arith.addf %arg9, %108 : vector<1x32xf32>
        %110 = vector.extract_strided_slice %99 {offsets = [0, 1, 0], sizes = [1, 1, 32], strides = [1, 1, 1]} : vector<1x8x32xf32> to vector<1x1x32xf32>
        %111 = vector.shape_cast %110 : vector<1x1x32xf32> to vector<1x32xf32>
        %112 = arith.addf %106, %109 : vector<1x32xf32>
        %113 = arith.subf %111, %112 : vector<1x32xf32>
        %114 = vector.broadcast %cst : f32 to vector<1x32xf32>
        %115 = arith.mulf %114, %113 : vector<1x32xf32>
        %116 = arith.addf %112, %115 : vector<1x32xf32>
        %117 = vector.broadcast %cst_0 : f32 to vector<1x32xf32>
        %118 = arith.mulf %117, %113 : vector<1x32xf32>
        %119 = arith.addf %109, %118 : vector<1x32xf32>
        %120 = vector.extract_strided_slice %99 {offsets = [0, 2, 0], sizes = [1, 1, 32], strides = [1, 1, 1]} : vector<1x8x32xf32> to vector<1x1x32xf32>
        %121 = vector.shape_cast %120 : vector<1x1x32xf32> to vector<1x32xf32>
        %122 = arith.addf %116, %119 : vector<1x32xf32>
        %123 = arith.subf %121, %122 : vector<1x32xf32>
        %124 = vector.broadcast %cst : f32 to vector<1x32xf32>
        %125 = arith.mulf %124, %123 : vector<1x32xf32>
        %126 = arith.addf %122, %125 : vector<1x32xf32>
        %127 = vector.broadcast %cst_0 : f32 to vector<1x32xf32>
        %128 = arith.mulf %127, %123 : vector<1x32xf32>
        %129 = arith.addf %119, %128 : vector<1x32xf32>
        %130 = vector.extract_strided_slice %99 {offsets = [0, 3, 0], sizes = [1, 1, 32], strides = [1, 1, 1]} : vector<1x8x32xf32> to vector<1x1x32xf32>
        %131 = vector.shape_cast %130 : vector<1x1x32xf32> to vector<1x32xf32>
        %132 = arith.addf %126, %129 : vector<1x32xf32>
        %133 = arith.subf %131, %132 : vector<1x32xf32>
        %134 = vector.broadcast %cst : f32 to vector<1x32xf32>
        %135 = arith.mulf %134, %133 : vector<1x32xf32>
        %136 = arith.addf %132, %135 : vector<1x32xf32>
        %137 = vector.broadcast %cst_0 : f32 to vector<1x32xf32>
        %138 = arith.mulf %137, %133 : vector<1x32xf32>
        %139 = arith.addf %129, %138 : vector<1x32xf32>
        %140 = vector.extract_strided_slice %99 {offsets = [0, 4, 0], sizes = [1, 1, 32], strides = [1, 1, 1]} : vector<1x8x32xf32> to vector<1x1x32xf32>
        %141 = vector.shape_cast %140 : vector<1x1x32xf32> to vector<1x32xf32>
        %142 = arith.addf %136, %139 : vector<1x32xf32>
        %143 = arith.subf %141, %142 : vector<1x32xf32>
        %144 = vector.broadcast %cst : f32 to vector<1x32xf32>
        %145 = arith.mulf %144, %143 : vector<1x32xf32>
        %146 = arith.addf %142, %145 : vector<1x32xf32>
        %147 = vector.broadcast %cst_0 : f32 to vector<1x32xf32>
        %148 = arith.mulf %147, %143 : vector<1x32xf32>
        %149 = arith.addf %139, %148 : vector<1x32xf32>
        %150 = vector.extract_strided_slice %99 {offsets = [0, 5, 0], sizes = [1, 1, 32], strides = [1, 1, 1]} : vector<1x8x32xf32> to vector<1x1x32xf32>
        %151 = vector.shape_cast %150 : vector<1x1x32xf32> to vector<1x32xf32>
        %152 = arith.addf %146, %149 : vector<1x32xf32>
        %153 = arith.subf %151, %152 : vector<1x32xf32>
        %154 = vector.broadcast %cst : f32 to vector<1x32xf32>
        %155 = arith.mulf %154, %153 : vector<1x32xf32>
        %156 = arith.addf %152, %155 : vector<1x32xf32>
        %157 = vector.broadcast %cst_0 : f32 to vector<1x32xf32>
        %158 = arith.mulf %157, %153 : vector<1x32xf32>
        %159 = arith.addf %149, %158 : vector<1x32xf32>
        %160 = vector.extract_strided_slice %99 {offsets = [0, 6, 0], sizes = [1, 1, 32], strides = [1, 1, 1]} : vector<1x8x32xf32> to vector<1x1x32xf32>
        %161 = vector.shape_cast %160 : vector<1x1x32xf32> to vector<1x32xf32>
        %162 = arith.addf %156, %159 : vector<1x32xf32>
        %163 = arith.subf %161, %162 : vector<1x32xf32>
        %164 = vector.broadcast %cst : f32 to vector<1x32xf32>
        %165 = arith.mulf %164, %163 : vector<1x32xf32>
        %166 = arith.addf %162, %165 : vector<1x32xf32>
        %167 = vector.broadcast %cst_0 : f32 to vector<1x32xf32>
        %168 = arith.mulf %167, %163 : vector<1x32xf32>
        %169 = arith.addf %159, %168 : vector<1x32xf32>
        %170 = vector.extract_strided_slice %99 {offsets = [0, 7, 0], sizes = [1, 1, 32], strides = [1, 1, 1]} : vector<1x8x32xf32> to vector<1x1x32xf32>
        %171 = vector.shape_cast %170 : vector<1x1x32xf32> to vector<1x32xf32>
        %172 = arith.addf %166, %169 : vector<1x32xf32>
        %173 = arith.subf %171, %172 : vector<1x32xf32>
        %174 = vector.broadcast %cst : f32 to vector<1x32xf32>
        %175 = arith.mulf %174, %173 : vector<1x32xf32>
        %176 = arith.addf %172, %175 : vector<1x32xf32>
        %177 = vector.broadcast %cst_0 : f32 to vector<1x32xf32>
        %178 = arith.mulf %177, %173 : vector<1x32xf32>
        %179 = arith.addf %169, %178 : vector<1x32xf32>
        %180 = vector.shape_cast %106 : vector<1x32xf32> to vector<1x1x32xf32>
        %181 = vector.shape_cast %116 : vector<1x32xf32> to vector<1x1x32xf32>
        %182 = vector.shape_cast %126 : vector<1x32xf32> to vector<1x1x32xf32>
        %183 = vector.shape_cast %136 : vector<1x32xf32> to vector<1x1x32xf32>
        %184 = vector.shape_cast %146 : vector<1x32xf32> to vector<1x1x32xf32>
        %185 = vector.shape_cast %156 : vector<1x32xf32> to vector<1x1x32xf32>
        %186 = vector.shape_cast %166 : vector<1x32xf32> to vector<1x1x32xf32>
        %187 = vector.shape_cast %176 : vector<1x32xf32> to vector<1x1x32xf32>
        %188 = tpu.concatenate %180, %181, %182, %183, %184, %185, %186, %187 in 1 : vector<1x1x32xf32>, vector<1x1x32xf32>, vector<1x1x32xf32>, vector<1x1x32xf32>, vector<1x1x32xf32>, vector<1x1x32xf32>, vector<1x1x32xf32>, vector<1x1x32xf32> -> vector<1x8x32xf32>
        %c0_20 = arith.constant 0 : index
        %189 = arith.index_cast %97 : i32 to index
        %c0_21 = arith.constant 0 : index
        %190 = vector.load %arg4[%c0_20, %189, %c0_21] : memref<1x8x32xf32, #tpu.memory_space<vmem>>, vector<1x8x32xf32>
        tpu.vector_store %arg4[%c0_20, %189, %c0_21], %188 {strides = array<i32>} : memref<1x8x32xf32, #tpu.memory_space<vmem>>, vector<1x8x32xf32>,
        scf.yield %176, %179 : vector<1x32xf32>, vector<1x32xf32>
      }
      %c0_i32_13 = arith.constant 0 : i32
      %c0_14 = arith.constant 0 : index
      %c0_15 = arith.constant 0 : index
      %94 = vector.load %arg5[%c0_14, %c0_15] : memref<1x32xf32, #tpu.memory_space<vmem>>, vector<1x32xf32>
      tpu.vector_store %arg5[%c0_14, %c0_15], %93#0 {strides = array<i32>} : memref<1x32xf32, #tpu.memory_space<vmem>>, vector<1x32xf32>,
      %c0_16 = arith.constant 0 : index
      %c0_17 = arith.constant 0 : index
      %95 = vector.load %arg6[%c0_16, %c0_17] : memref<1x32xf32, #tpu.memory_space<vmem>>, vector<1x32xf32>
      tpu.vector_store %arg6[%c0_16, %c0_17], %93#1 {strides = array<i32>} : memref<1x32xf32, #tpu.memory_space<vmem>>, vector<1x32xf32>,
    } else {
    }
    %c0_i32_2 = arith.constant 0 : i32
    %3 = arith.cmpi sgt, %arg2, %c0_i32_2 : i32
    %4 = arith.extui %3 : i1 to i32
    %cst_3 = arith.constant 3.000000e-01 : f32
    %cst_4 = arith.constant 3.000000e-02 : f32
    %c0_i32_5 = arith.constant 0 : i32
    %5 = arith.cmpi ne, %4, %c0_i32_5 : i32
    scf.if %5 {
      %c0 = arith.constant 0 : index
      %c0_6 = arith.constant 0 : index
      %6 = vector.load %arg5[%c0, %c0_6] : memref<1x32xf32, #tpu.memory_space<vmem>>, vector<1x32xf32>
      %c0_7 = arith.constant 0 : index
      %c0_8 = arith.constant 0 : index
      %7 = vector.load %arg6[%c0_7, %c0_8] : memref<1x32xf32, #tpu.memory_space<vmem>>, vector<1x32xf32>
      %c0_i32_9 = arith.constant 0 : i32
      %c8_i32 = arith.constant 8 : i32
      %8 = arith.muli %c0_i32_9, %c8_i32 : i32
      %9 = tpu.assume_multiple %8, 8 : i32
      %c0_10 = arith.constant 0 : index
      %10 = arith.index_cast %9 : i32 to index
      %c0_11 = arith.constant 0 : index
      %11 = vector.load %arg3[%c0_10, %10, %c0_11] : memref<1x8x32xf32, #tpu.memory_space<vmem>>, vector<1x8x32xf32>
      %12 = vector.extract_strided_slice %11 {offsets = [0, 0, 0], sizes = [1, 1, 32], strides = [1, 1, 1]} : vector<1x8x32xf32> to vector<1x1x32xf32>
      %13 = vector.shape_cast %12 : vector<1x1x32xf32> to vector<1x32xf32>
      %14 = arith.addf %6, %7 : vector<1x32xf32>
      %15 = arith.subf %13, %14 : vector<1x32xf32>
      %16 = vector.broadcast %cst_3 : f32 to vector<1x32xf32>
      %17 = arith.mulf %16, %15 : vector<1x32xf32>
      %18 = arith.addf %14, %17 : vector<1x32xf32>
      %19 = vector.broadcast %cst_4 : f32 to vector<1x32xf32>
      %20 = arith.mulf %19, %15 : vector<1x32xf32>
      %21 = arith.addf %7, %20 : vector<1x32xf32>
      %22 = vector.extract_strided_slice %11 {offsets = [0, 1, 0], sizes = [1, 1, 32], strides = [1, 1, 1]} : vector<1x8x32xf32> to vector<1x1x32xf32>
      %23 = vector.shape_cast %22 : vector<1x1x32xf32> to vector<1x32xf32>
      %24 = arith.addf %18, %21 : vector<1x32xf32>
      %25 = arith.subf %23, %24 : vector<1x32xf32>
      %26 = vector.broadcast %cst_3 : f32 to vector<1x32xf32>
      %27 = arith.mulf %26, %25 : vector<1x32xf32>
      %28 = arith.addf %24, %27 : vector<1x32xf32>
      %29 = vector.broadcast %cst_4 : f32 to vector<1x32xf32>
      %30 = arith.mulf %29, %25 : vector<1x32xf32>
      %31 = arith.addf %21, %30 : vector<1x32xf32>
      %32 = vector.extract_strided_slice %11 {offsets = [0, 2, 0], sizes = [1, 1, 32], strides = [1, 1, 1]} : vector<1x8x32xf32> to vector<1x1x32xf32>
      %33 = vector.shape_cast %32 : vector<1x1x32xf32> to vector<1x32xf32>
      %34 = arith.addf %28, %31 : vector<1x32xf32>
      %35 = arith.subf %33, %34 : vector<1x32xf32>
      %36 = vector.broadcast %cst_3 : f32 to vector<1x32xf32>
      %37 = arith.mulf %36, %35 : vector<1x32xf32>
      %38 = arith.addf %34, %37 : vector<1x32xf32>
      %39 = vector.broadcast %cst_4 : f32 to vector<1x32xf32>
      %40 = arith.mulf %39, %35 : vector<1x32xf32>
      %41 = arith.addf %31, %40 : vector<1x32xf32>
      %42 = vector.extract_strided_slice %11 {offsets = [0, 3, 0], sizes = [1, 1, 32], strides = [1, 1, 1]} : vector<1x8x32xf32> to vector<1x1x32xf32>
      %43 = vector.shape_cast %42 : vector<1x1x32xf32> to vector<1x32xf32>
      %44 = arith.addf %38, %41 : vector<1x32xf32>
      %45 = arith.subf %43, %44 : vector<1x32xf32>
      %46 = vector.broadcast %cst_3 : f32 to vector<1x32xf32>
      %47 = arith.mulf %46, %45 : vector<1x32xf32>
      %48 = arith.addf %44, %47 : vector<1x32xf32>
      %49 = vector.broadcast %cst_4 : f32 to vector<1x32xf32>
      %50 = arith.mulf %49, %45 : vector<1x32xf32>
      %51 = arith.addf %41, %50 : vector<1x32xf32>
      %52 = vector.extract_strided_slice %11 {offsets = [0, 4, 0], sizes = [1, 1, 32], strides = [1, 1, 1]} : vector<1x8x32xf32> to vector<1x1x32xf32>
      %53 = vector.shape_cast %52 : vector<1x1x32xf32> to vector<1x32xf32>
      %54 = arith.addf %48, %51 : vector<1x32xf32>
      %55 = arith.subf %53, %54 : vector<1x32xf32>
      %56 = vector.broadcast %cst_3 : f32 to vector<1x32xf32>
      %57 = arith.mulf %56, %55 : vector<1x32xf32>
      %58 = arith.addf %54, %57 : vector<1x32xf32>
      %59 = vector.broadcast %cst_4 : f32 to vector<1x32xf32>
      %60 = arith.mulf %59, %55 : vector<1x32xf32>
      %61 = arith.addf %51, %60 : vector<1x32xf32>
      %62 = vector.extract_strided_slice %11 {offsets = [0, 5, 0], sizes = [1, 1, 32], strides = [1, 1, 1]} : vector<1x8x32xf32> to vector<1x1x32xf32>
      %63 = vector.shape_cast %62 : vector<1x1x32xf32> to vector<1x32xf32>
      %64 = arith.addf %58, %61 : vector<1x32xf32>
      %65 = arith.subf %63, %64 : vector<1x32xf32>
      %66 = vector.broadcast %cst_3 : f32 to vector<1x32xf32>
      %67 = arith.mulf %66, %65 : vector<1x32xf32>
      %68 = arith.addf %64, %67 : vector<1x32xf32>
      %69 = vector.broadcast %cst_4 : f32 to vector<1x32xf32>
      %70 = arith.mulf %69, %65 : vector<1x32xf32>
      %71 = arith.addf %61, %70 : vector<1x32xf32>
      %72 = vector.extract_strided_slice %11 {offsets = [0, 6, 0], sizes = [1, 1, 32], strides = [1, 1, 1]} : vector<1x8x32xf32> to vector<1x1x32xf32>
      %73 = vector.shape_cast %72 : vector<1x1x32xf32> to vector<1x32xf32>
      %74 = arith.addf %68, %71 : vector<1x32xf32>
      %75 = arith.subf %73, %74 : vector<1x32xf32>
      %76 = vector.broadcast %cst_3 : f32 to vector<1x32xf32>
      %77 = arith.mulf %76, %75 : vector<1x32xf32>
      %78 = arith.addf %74, %77 : vector<1x32xf32>
      %79 = vector.broadcast %cst_4 : f32 to vector<1x32xf32>
      %80 = arith.mulf %79, %75 : vector<1x32xf32>
      %81 = arith.addf %71, %80 : vector<1x32xf32>
      %82 = vector.extract_strided_slice %11 {offsets = [0, 7, 0], sizes = [1, 1, 32], strides = [1, 1, 1]} : vector<1x8x32xf32> to vector<1x1x32xf32>
      %83 = vector.shape_cast %82 : vector<1x1x32xf32> to vector<1x32xf32>
      %84 = arith.addf %78, %81 : vector<1x32xf32>
      %85 = arith.subf %83, %84 : vector<1x32xf32>
      %86 = vector.broadcast %cst_3 : f32 to vector<1x32xf32>
      %87 = arith.mulf %86, %85 : vector<1x32xf32>
      %88 = arith.addf %84, %87 : vector<1x32xf32>
      %89 = vector.broadcast %cst_4 : f32 to vector<1x32xf32>
      %90 = arith.mulf %89, %85 : vector<1x32xf32>
      %91 = arith.addf %81, %90 : vector<1x32xf32>
      %92 = vector.shape_cast %18 : vector<1x32xf32> to vector<1x1x32xf32>
      %93 = vector.shape_cast %28 : vector<1x32xf32> to vector<1x1x32xf32>
      %94 = vector.shape_cast %38 : vector<1x32xf32> to vector<1x1x32xf32>
      %95 = vector.shape_cast %48 : vector<1x32xf32> to vector<1x1x32xf32>
      %96 = vector.shape_cast %58 : vector<1x32xf32> to vector<1x1x32xf32>
      %97 = vector.shape_cast %68 : vector<1x32xf32> to vector<1x1x32xf32>
      %98 = vector.shape_cast %78 : vector<1x32xf32> to vector<1x1x32xf32>
      %99 = vector.shape_cast %88 : vector<1x32xf32> to vector<1x1x32xf32>
      %100 = tpu.concatenate %92, %93, %94, %95, %96, %97, %98, %99 in 1 : vector<1x1x32xf32>, vector<1x1x32xf32>, vector<1x1x32xf32>, vector<1x1x32xf32>, vector<1x1x32xf32>, vector<1x1x32xf32>, vector<1x1x32xf32>, vector<1x1x32xf32> -> vector<1x8x32xf32>
      %c0_12 = arith.constant 0 : index
      %101 = arith.index_cast %9 : i32 to index
      %c0_13 = arith.constant 0 : index
      %102 = vector.load %arg4[%c0_12, %101, %c0_13] : memref<1x8x32xf32, #tpu.memory_space<vmem>>, vector<1x8x32xf32>
      tpu.vector_store %arg4[%c0_12, %101, %c0_13], %100 {strides = array<i32>} : memref<1x8x32xf32, #tpu.memory_space<vmem>>, vector<1x8x32xf32>,
      %c1_i32 = arith.constant 1 : i32
      %c0_14 = arith.constant 0 : index
      %c0_15 = arith.constant 0 : index
      %103 = vector.load %arg5[%c0_14, %c0_15] : memref<1x32xf32, #tpu.memory_space<vmem>>, vector<1x32xf32>
      tpu.vector_store %arg5[%c0_14, %c0_15], %88 {strides = array<i32>} : memref<1x32xf32, #tpu.memory_space<vmem>>, vector<1x32xf32>,
      %c0_16 = arith.constant 0 : index
      %c0_17 = arith.constant 0 : index
      %104 = vector.load %arg6[%c0_16, %c0_17] : memref<1x32xf32, #tpu.memory_space<vmem>>, vector<1x32xf32>
      tpu.vector_store %arg6[%c0_16, %c0_17], %91 {strides = array<i32>} : memref<1x32xf32, #tpu.memory_space<vmem>>, vector<1x32xf32>,
    } else {
    }
    return
  }
  func.func @transform_0(%arg0: i32, %arg1: i32, %arg2: i32) -> (i32, i32, i32) {
    %c0_i32 = arith.constant 0 : i32
    return %arg0, %arg2, %arg1 : i32, i32, i32
  }
  func.func @transform_1(%arg0: i32, %arg1: i32, %arg2: i32) -> (i32, i32, i32) {
    %c0_i32 = arith.constant 0 : i32
    return %arg0, %arg2, %arg1 : i32, i32, i32
  }
}

</mosaic_0001>

<bundles_post_ra>
// kernel: tpu_custom_call.1
= control target key start
LH: loop header
LB: loop body
LE: loop exit
PB: predicated region body
PF: predicated region fallthrough
CT: control target
= control target key end

     0   :  { %6 = vsyncpa [#allocation5], 0  ;;  %s1231_s0 = inlined_call_operand.hbm [shape: f32[2,8,32], index: 0, kind: input, shape index: {}]   ;;  %s1232_s1 = inlined_call_operand.hbm [shape: f32[2,8,32], index: 1, kind: output, shape index: {}]  }
   0x1   :  { %8 = vsyncpa [#allocation5 + $0x1], 0 }
   0x2   :  { %9 = vsyncpa [#allocation6], 0 }
   0x3   :  { %11 = vsyncpa [#allocation6 + $0x1], 0  ;;  %s1042_s6 = smov 0   ;;  %s1044_s7 = smov 0  }
   0x4   :  { %s1046_s8 = smov 0   ;;  %s1048_s9 = smov 0  }
   0x5   :  { %s1050_s10 = smov 0   ;;  %s1052_s11 = smov 0  }
   0x6 LB: > { %s841_s12 = sadd.s32 4294967295, %s1028_s11   ;;  %s842_s13 = sadd.s32 4294967294, %s1028_s11   ;;  %s1028_s11 = sphi %s1052_s11, %s17_s11   ;;  %s1024_s10 = sphi %s1050_s10, %s1248_s10   ;;  %s1020_s9 = sphi %s1048_s9, %s1247_s9   ;;  %s1016_s8 = sphi %s1046_s8, %s1246_s8   ;;  %s1012_s7 = sphi %s1044_s7, %s1245_s7   ;;  %s1008_s6 = sphi %s1042_s6, %s1244_s6  }
   0x7   : > { %s36_s14 = sadd.s32 1, %s1024_s10  ;;  %s47_s15 = sadd.s32 1, %s1016_s8 }
   0x8   : > { %p38_p0 = scmp.ge.s32.totalorder %s36_s14, 2  ;;  %p54_p1 = scmp.ne.s32.totalorder %s1016_s8, %s1012_s7 }
   0x9   : > { %p55_p2 = scmp.eq.s32.totalorder %s1028_s11, 0  ;;  %p60_p3 = scmp.ne.s32.totalorder %s1012_s7, %s1008_s6 }
   0xa   : > { %s1250_s14 = smov (%p38_p0, %s36_s14), 0  ;;  %p61_p5 = scmp.eq.s32.totalorder %s841_s12, 0 }
   0xb   : > { %p1083_p4 = por %p55_p2, %p54_p1  ;;  %s40_s17 = ssub.s32 %s1024_s10, %s1250_s14 }
   0xc   : > { %p88_p6 = scmp.eq.s32.totalorder %s841_s12, 1  ;;  %p45_p7 = scmp.eq.s32.totalorder %s40_s17, 0 }
   0xd   : > { %p1089_p8 = por %p61_p5, %p60_p3  ;;  %p94_p10 = scmp.eq.s32.totalorder %s842_s13, 1 }
   0xe   : > { %p1093_p9 = por %p88_p6, %p54_p1  ;;  %p866_p13 = scmp.lt.s32.totalorder %s1028_s11, 2 }
   0xf   : > { %s1098_s20 = scalar_select %p45_p7, %s1016_s8, %s47_s15  }
  0x10   : > { %s1236_s19 = scalar_select %p1093_p9, 1, 0 }
  0x11   : > { %p1100_p11 = por %p94_p10, %p60_p3  ;;  %s114_s22 = sand.u32 1, %s1016_s8  }
  0x12   : > { %s845_s23 = sshll.u32 %s114_s22, 3  ;;  %s846_s24 = sshll.u32 %s1024_s10, 7 }
  0x13   : > { %s1237_s21 = scalar_select %p1100_p11, 1, 0 }
  0x14   : > { %s1111_s27 = scalar_lea.hbm %s1231_s0, %s846_s24  ;;  %s118_s28 = scalar_lea.vmem [#allocation4], %s845_s23 }
  0x15   : > { %s127_s29 = sshll.u32 %s118_s28, 4  ;;  %p1117_p0 = pnand %p866_p13, %p1083_p4  ;;  %s1113_s29 = int_to_ptr.vmem [resolvable:$true] %s127_s29 }
  0x16   : > { %s115_s2 = scalar_lea.sflag [#allocation5], %s114_s22  ;;  %s916_s3 = scalar_lea.hbm %s1111_s27, 128 }
  0x17   : > { %p917_p3 = scmp.ne.s32.totalorder %s1111_s27, %s916_s3  ;;  %p918_p5 = pneg %p1117_p0 }
  0x18   : > { %s921_s12 = scalar_lea.hbm %s1231_s0, 256  ;;  %p922_p4 = scmp.lt.u32.totalorder %s1111_s27, %s1231_s0 }
  0x19   : > { %p919_p6 = pnand %p918_p5, %p917_p3  ;;  %p923_p10 = scmp.lt.u32.totalorder %s921_s12, %s916_s3 }
  0x1a   : > { %p925_p12 = scmp.lt.u32.totalorder %s916_s3, %s1111_s27 }
  0x1b   : > { %p920_p7 = pneg %p919_p6  ;;  %p924_p13 = por %p923_p10, %p922_p4 }
  0x1d   : > { %p926_p1 = por %p925_p12, %p924_p13 }
  0x1f   : > { %p927_p2 = pnand %p926_p1, %p920_p7 }
  0x21   : > { %930 = shalt.err (!%p927_p2)
}
  0x22   : > { %s931_s16 = scalar_lea.vmem %s1113_s29, 128  ;;  %s1030_s17 = smov [#allocation4]  }
  0x23   : > { %p932_p3 = scmp.ne.s32.totalorder %s1113_s29, %s931_s16  ;;  %s936_s22 = sshll.u32 %s1030_s17, 4  ;;  %s937_s22 = int_to_ptr.vmem [resolvable:$false] %s936_s22 }
  0x24   : > { %s938_s23 = scalar_lea.vmem %s937_s22, 256  ;;  %p939_p9 = scmp.lt.s32.totalorder %s1113_s29, %s937_s22 }
  0x25   : > { %p934_p6 = pnand %p932_p3, %p918_p5  ;;  %p940_p4 = scmp.lt.s32.totalorder %s938_s23, %s931_s16 }
  0x27   : > { %p935_p11 = pneg %p934_p6  ;;  %p941_p10 = por %p940_p4, %p939_p9 }
  0x29   : > { %p942_p12 = pnand %p941_p10, %p935_p11 }
  0x2b   : > { %945 = shalt.err (!%p942_p12)
}
  0x2c   : > { %861 = dma.hbm_to_vmem [thread:$0]  (!%p1117_p0), %s1111_s27, 128, %s1113_s29, %s115_s2  }
  0x2d   : > { %p1239_p1 = scmp.lt.s32.totalorder %s1028_s11, 3  ;;  %p1240_p2 = scmp.ge.s32.totalorder %s1028_s11, 1 }
  0x2f   : > { %p133_p5 = pnand %p1240_p2, %p1239_p1 }
  0x30   : > { %s1153_s24 = sand.u32 (!%p133_p5), 1, %s1012_s7  }
  0x31   : > { %136 = sbr.rel (%p133_p5) target bundleno = 175 (0xaf), region = 24  ;;  %s848_s25 = sshll.u32 (!%p133_p5), %s1153_s24, 3 }
  0x32   : > { %s139_s26 = scalar_lea.sflag (!%p133_p5), [#allocation5], %s1153_s24  ;;  %s142_s28 = scalar_lea.vmem (!%p133_p5), [#allocation4], %s848_s25 }
  0x38   : > { %999 = dma.done.wait (%p1089_p8), %s139_s26, 128  }
  0x39   : > { %1001 = vsyncadd (%p1089_p8), %s139_s26, 4294967168  ;;  %v1163_v0 = vld [vmem:[%s142_s28] sm:$0xff]  ;;  %vm314_vm0 = vcmask 1040384   ;;  %vm316_vm1 = vcmask 1041408   ;;  %vm318_vm2 = vcmask 1042432   ;;  %vm320_vm3 = vcmask 1043456  }
  0x3a   : > { %v167_v1 = vrot.slane %v1163_v0, 7  ;;  %vm322_vm4 = vcmask 1044480   ;;  %vm324_vm5 = vcmask 1045504   ;;  %s160_s18 = scalar_lea.vmem [#allocation7], %s848_s25  ;;  %s851_s29 = sshll.u32 %s1020_s9, 7  ;;  %vm326_vm6 = vcmask 1046528  }
  0x3b   : > { %s756_s27 = sshll.u32 %s160_s18, 4  ;;  %vm328_vm7 = vcmask 261120   ;;  %s1184_s3 = scalar_lea.hbm %s1232_s1, %s851_s29  ;;  %s1179_s27 = int_to_ptr.vmem [resolvable:$true] %s756_s27 }
  0x3c   : > { %v169_v2 = vsub.f32 %v1163_v0, %v167_v1  ;;  %s741_s4 = scalar_lea.sflag [#allocation6], %s1153_s24  ;;  %s946_s5 = scalar_lea.vmem %s1179_s27, 128 }
  0x3d   : > { %p947_p8 = scmp.ne.s32.totalorder %s1179_s27, %s946_s5  ;;  %p1241_p9 = scmp.ne.s32.totalorder %s1236_s19, 0 }
  0x3e   : > { %v171_v3 = vrot.slane %v169_v2, 1  ;;  %s1031_s9 = smov [#allocation7]  }
  0x3f   : > { %p948_p11 = pnand %p947_p8, %p1241_p9  ;;  %s950_s12 = sshll.u32 %s1031_s9, 4  ;;  %s951_s12 = int_to_ptr.vmem [resolvable:$false] %s950_s12 }
  0x40   : > { %v173_v4 = vadd.f32 %v171_v3, %v1163_v0  ;;  %s952_s13 = scalar_lea.vmem %s951_s12, 256  ;;  %p953_p7 = scmp.lt.s32.totalorder %s1179_s27, %s951_s12 }
  0x41   : > { %p949_p0 = pneg %p948_p11  ;;  %p954_p13 = scmp.lt.s32.totalorder %s952_s13, %s946_s5 }
  0x42   : > { %v175_v5 = vrot.slane %v173_v4, 7 }
  0x43   : > { %p955_p3 = por %p954_p13, %p953_p7 }
  0x44   : > { %v177_v6 = vsub.f32 %v1163_v0, %v175_v5 }
  0x45   : > { %p956_p6 = pnand %p955_p3, %p949_p0 }
  0x46   : > { %v178_v7 = vmul.f32 0.3, %v177_v6  ;;  %v183_v8 = vmul.f32 0.03, %v177_v6 }
  0x48   : > { %v180_v9 = vrot.slane %v178_v7, 1  ;;  %v184_v10 = vadd.f32 %v183_v8, %v169_v2 }
  0x4a   : > { %v182_v11 = vadd.f32 %v180_v9, %v173_v4  ;;  %v186_v12 = vrot.slane %v184_v10, 1 }
  0x4c   : > { %v188_v13 = vadd.f32 %v186_v12, %v182_v11  ;;  %v294_v18 = vrot.slane %v182_v11, 7 }
  0x4e   : > { %v190_v14 = vrot.slane %v188_v13, 6  ;;  %v315_v23 = vsel %vm314_vm0, %v1163_v0, %v294_v18 }
  0x50   : > { %v192_v15 = vsub.f32 %v1163_v0, %v190_v14 }
  0x52   : > { %v193_v16 = vmul.f32 0.3, %v192_v15  ;;  %v198_v17 = vmul.f32 0.03, %v192_v15 }
  0x54   : > { %v195_v19 = vrot.slane %v193_v16, 2  ;;  %v200_v20 = vrot.slane %v198_v17, 1 }
  0x56   : > { %v197_v21 = vadd.f32 %v195_v19, %v188_v13  ;;  %v202_v22 = vadd.f32 %v200_v20, %v184_v10 }
  0x58   : > { %v204_v24 = vrot.slane %v202_v22, 1  ;;  %v297_v25 = vrot.slane %v197_v21, 6 }
  0x5a   : > { %v206_v26 = vadd.f32 %v204_v24, %v197_v21  ;;  %v317_v27 = vsel %vm316_vm1, %v315_v23, %v297_v25 }
  0x5c   : > { %v208_v28 = vrot.slane %v206_v26, 5 }
  0x5e   : > { %v210_v29 = vsub.f32 %v1163_v0, %v208_v28 }
  0x60   : > { %v211_v30 = vmul.f32 0.3, %v210_v29  ;;  %v216_v31 = vmul.f32 0.03, %v210_v29 }
  0x62   : > { %v213_v32 = vrot.slane %v211_v30, 3  ;;  %v218_v33 = vrot.slane %v216_v31, 2 }
  0x64   : > { %v215_v34 = vadd.f32 %v213_v32, %v206_v26  ;;  %v220_v35 = vadd.f32 %v218_v33, %v202_v22 }
  0x66   : > { %v222_v36 = vrot.slane %v220_v35, 1  ;;  %v300_v4 = vrot.slane %v215_v34, 5 }
  0x68   : > { %v224_v37 = vadd.f32 %v222_v36, %v215_v34  ;;  %v319_v8 = vsel %vm318_vm2, %v317_v27, %v300_v4 }
  0x6a   : > { %v226_v38 = vrot.slane %v224_v37, 4 }
  0x6c   : > { %v228_v39 = vsub.f32 %v1163_v0, %v226_v38 }
  0x6e   : > { %v229_v40 = vmul.f32 0.3, %v228_v39  ;;  %v234_v41 = vmul.f32 0.03, %v228_v39 }
  0x70   : > { %v231_v42 = vrot.slane %v229_v40, 4  ;;  %v236_v43 = vrot.slane %v234_v41, 3 }
  0x72   : > { %v233_v44 = vadd.f32 %v231_v42, %v224_v37  ;;  %v238_v45 = vadd.f32 %v236_v43, %v220_v35 }
  0x74   : > { %v240_v46 = vrot.slane %v238_v45, 1  ;;  %v303_v6 = vrot.slane %v233_v44, 4 }
  0x76   : > { %v242_v47 = vadd.f32 %v240_v46, %v233_v44  ;;  %v321_v11 = vsel %vm320_vm3, %v319_v8, %v303_v6 }
  0x78   : > { %v244_v48 = vrot.slane %v242_v47, 3 }
  0x7a   : > { %v246_v49 = vsub.f32 %v1163_v0, %v244_v48 }
  0x7c   : > { %v247_v50 = vmul.f32 0.3, %v246_v49  ;;  %v252_v51 = vmul.f32 0.03, %v246_v49 }
  0x7e   : > { %v249_v52 = vrot.slane %v247_v50, 5  ;;  %v254_v53 = vrot.slane %v252_v51, 4 }
  0x80   : > { %v251_v54 = vadd.f32 %v249_v52, %v242_v47  ;;  %v256_v55 = vadd.f32 %v254_v53, %v238_v45 }
  0x82   : > { %v258_v56 = vrot.slane %v256_v55, 1  ;;  %v306_v10 = vrot.slane %v251_v54, 3 }
  0x84   : > { %v260_v57 = vadd.f32 %v258_v56, %v251_v54  ;;  %v323_v15 = vsel %vm322_vm4, %v321_v11, %v306_v10 }
  0x86   : > { %v262_v58 = vrot.slane %v260_v57, 2 }
  0x88   : > { %v264_v59 = vsub.f32 %v1163_v0, %v262_v58 }
  0x8a   : > { %v265_v60 = vmul.f32 0.3, %v264_v59  ;;  %v270_v61 = vmul.f32 0.03, %v264_v59 }
  0x8c   : > { %v267_v62 = vrot.slane %v265_v60, 6  ;;  %v272_v63 = vrot.slane %v270_v61, 5 }
  0x8e   : > { %v269_v1 = vadd.f32 %v267_v62, %v260_v57  ;;  %v274_v2 = vadd.f32 %v272_v63, %v256_v55 }
  0x90   : > { %v276_v3 = vrot.slane %v274_v2, 1  ;;  %v309_v13 = vrot.slane %v269_v1, 2 }
  0x92   : > { %v278_v5 = vadd.f32 %v276_v3, %v269_v1  ;;  %v325_v17 = vsel %vm324_vm5, %v323_v15, %v309_v13 }
  0x94   : > { %v280_v7 = vrot.slane %v278_v5, 1 }
  0x96   : > { %v282_v9 = vsub.f32 %v1163_v0, %v280_v7 }
  0x98   : > { %v283_v12 = vmul.f32 0.3, %v282_v9 }
  0x9a   : > { %v285_v14 = vrot.slane %v283_v12, 7 }
  0x9c   : > { %v287_v16 = vadd.f32 %v285_v14, %v278_v5 }
  0x9e   : > { %v312_v18 = vrot.slane %v287_v16, 1 }
  0xa0   : > { %v327_v0 = vsel %vm326_vm6, %v325_v17, %v312_v18 }
  0xa1   : > { %329 = vst.msk [vmem:[%s160_s18] sm:$0xff] %vm328_vm7, %v327_v0 }
  0xa2   : > { %959 = shalt.err (!%p956_p6)
}
  0xa3   : > { %s960_s15 = scalar_lea.hbm %s1184_s3, 128  ;;  %s964_s22 = scalar_lea.hbm %s1232_s1, 256 }
  0xa4   : > { %p961_p4 = scmp.ne.s32.totalorder %s1184_s3, %s960_s15  ;;  %p965_p1 = scmp.lt.u32.totalorder %s1184_s3, %s1232_s1 }
  0xa5   : > { %p966_p2 = scmp.lt.u32.totalorder %s964_s22, %s960_s15  ;;  %p968_p8 = scmp.lt.u32.totalorder %s960_s15, %s1184_s3 }
  0xa6   : > { %p962_p10 = pnand %p961_p4, %p1241_p9 }
  0xa7   : > { %p967_p5 = por %p966_p2, %p965_p1 }
  0xa8   : > { %p963_p12 = pneg %p962_p10 }
  0xa9   : > { %p969_p11 = por %p968_p8, %p967_p5 }
  0xab   : > { %p970_p0 = pnand %p969_p11, %p963_p12 }
  0xad   : > { %973 = shalt.err (!%p970_p0)
}
  0xae   : > { %856 = dma.vmem_to_hbm [thread:$0]  (%p1241_p9), %s1179_s27, 128, %s1184_s3, %s741_s4  }
  0xaf PF: > { %s768_s25 = sand.u32 1, %s1008_s6   ;;  %p1242_p7 = scmp.ne.s32.totalorder %s1237_s21, 0 }
  0xb0   : > { %p1243_p13 = scmp.ge.s32.totalorder %s1028_s11, 2  ;;  %s769_s26 = scalar_lea.sflag [#allocation6], %s768_s25 }
  0xb2   : > { %p863_p3 = pnand %p1243_p13, %p1242_p7 }
  0xb4   : > { %1003 = dma.done.wait (!%p863_p3), %s769_s26, 128  }
  0xb5   : > { %1005 = vsyncadd (!%p863_p3), %s769_s26, 4294967168  ;;  %s17_s11 = sadd.s32 1, %s1028_s11   ;;  %s1244_s6 = smov %s1012_s7 }
  0xb6   : > { %p14_p6 = scmp.ge.s32.totalorder %s17_s11, 4   ;;  %s1245_s7 = smov %s1016_s8 }
  0xb7   : > { %s1246_s8 = smov %s1098_s20  ;;  %s1247_s9 = smov %s1024_s10 }
  0xb8   : > { %s1248_s10 = smov %s1250_s14  ;;  %16 = sbr.rel (!%p14_p6) target bundleno = 6 (0x6), region = 77 }
  0xbf   :  { %774 = vsyncpa [#allocation5], 1 }
  0xc0   :  { %776 = vsyncpa [#allocation5 + $0x1], 1 }
  0xc1   :  { %777 = vsyncpa [#allocation6], 1 }
  0xc2   :  { %779 = vsyncpa [#allocation6 + $0x1], 1 }

</bundles_post_ra>
